<compile_context>
chip_gen: v6e
topology: v6e:2x2x1
jax: 0.10.0
libtpu: 0.0.40
codegen_flags: <defaults>
</compile_context>

<pallas_src>
import jax
import jax.numpy as jnp
from jax import lax
from jax.experimental import pallas as pl
from jax.experimental.pallas import tpu as pltpu

LANE = 128
SUBLANE_BF16 = 16     # bf16 packs 2 rows per sublane -> native (16, 128) tile
HEAD_ROWS = 8         # head output padded to 8 sublane rows (row 0 = logits)


def _round_up(x, m):
    return ((x + m - 1) // m) * m


def _vmem_capacity_bytes():
    try:
        return int(pltpu.get_tpu_info().vmem_capacity_bytes)
    except Exception:
        return 64 << 20   # conservative default (v7x per-TensorCore VMEM)


def _make_kernel(num_hidden):
    """Fused MLP kernel for one batch tile; weights stay resident in VMEM."""

    def kernel(*refs):
        x_ref, o_ref = refs[0], refs[-1]
        wb = refs[1:-1]
        # Cast activations to bf16 in-kernel (x arrives unpadded, original dtype).
        h = x_ref[...].astype(jnp.bfloat16)
        for li in range(num_hidden):
            w = wb[2 * li][...]          # (K, Hp) bf16
            b = wb[2 * li + 1][...]      # (1, Hp) f32
            h = jnp.dot(h, w, preferred_element_type=jnp.float32)
            h = jnp.maximum(h + b, 0.0).astype(jnp.bfloat16)
            # TODO(synk): training-mode Dropout would mask h here; identity in eval.
        w_head_t = wb[2 * num_hidden][...]      # (8, Hp) bf16, row 0 = w_out^T
        b_head = wb[2 * num_hidden + 1][...]    # (1, 1) f32
        # Transposed head: (8, Hp) x (TB, Hp)^T -> (8, TB).  Keeps the lane axis
        # on the batch tile so the store is lane-dense and only 8 sublanes tall.
        out_t = lax.dot_general(
            w_head_t, h,
            dimension_numbers=(((1,), (1,)), ((), ())),
            preferred_element_type=jnp.float32,
        )
        o_ref[...] = (out_t + b_head).astype(o_ref.dtype)

    return kernel


def prepare_params(params):
    """One-time pad (hidden dims -> multiples of 128) + bf16 cast of weights.

    Hoisted out of the per-call forward so it is not re-run (and re-DMA'd)
    on every inference call.  The head weight is stored transposed, padded to
    HEAD_ROWS sublane rows.  The input dim D is deliberately NOT padded.
    """
    *hidden_layers, (w_out, b_out) = params
    prepped = []
    prev_out_p = None
    for (w, b) in hidden_layers:
        d_in, d_out = w.shape
        d_in_p = d_in if prev_out_p is None else prev_out_p   # never pad input_dim
        d_out_p = _round_up(d_out, LANE)
        wp = jnp.zeros((d_in_p, d_out_p), jnp.bfloat16)
        wp = wp.at[:d_in, :d_out].set(w.astype(jnp.bfloat16))
        bp = jnp.zeros((1, d_out_p), jnp.float32)
        bp = bp.at[:, :d_out].set(jnp.asarray(b, jnp.float32).reshape(1, -1))
        prepped.append((wp, bp))
        prev_out_p = d_out_p
    d_in = w_out.shape[0]
    d_in_p = d_in if prev_out_p is None else prev_out_p
    w_head_t = jnp.zeros((HEAD_ROWS, d_in_p), jnp.bfloat16)
    w_head_t = w_head_t.at[0, :d_in].set(w_out[:, 0].astype(jnp.bfloat16))
    b_head = jnp.asarray(b_out, jnp.float32).reshape(1, 1)
    prepped.append((w_head_t, b_head))
    return prepped


def interaction_classifier_forward(x, prepped_params):
    """Fused MLP forward; reproduces torch's `.squeeze()` on the (B, 1) head."""
    B, D = x.shape
    hidden = prepped_params[:-1]
    w_head_t, b_head = prepped_params[-1]
    num_hidden = len(hidden)

    vmem_cap = _vmem_capacity_bytes()
    budget = int(0.75 * vmem_cap)        # ~96 MiB on v5e/v6e, ~48 MiB on v7x

    # Batch tile: multiple of 16 (bf16-native), >=4 grid programs when B allows
    # (pipelining + v7x two-TensorCore sharding), generation-capped.
    cap = 1024 if vmem_cap >= (96 << 20) else 512
    TB = min(cap,
             _round_up(max(-(-B // 4), 1), SUBLANE_BF16),
             _round_up(B, SUBLANE_BF16))

    hid_p = sum(w.shape[1] for (w, _) in hidden)   # total padded hidden width

    def _footprint(tb):
        w_bytes = sum(w.size * 2 + b.size * 4 for (w, b) in hidden)
        w_bytes += w_head_t.size * 2 + b_head.size * 4
        acts = tb * hid_p * (4 + 2)                          # f32 + bf16 activations
        tiles = 2 * tb * D * x.dtype.itemsize + 2 * HEAD_ROWS * tb * 4
        return 2 * w_bytes + acts + tiles                    # weights x2 (worst case)

    while TB > SUBLANE_BF16 and 2 * _footprint(TB) > budget:
        TB = max(SUBLANE_BF16, _round_up(TB // 2, SUBLANE_BF16))

    Bp = _round_up(B, TB)
    grid = (Bp // TB,)
    vmem_limit = min(max(2 * _footprint(TB), 16 << 20), budget)

    # Pad only the batch axis, and only when ragged; D is never padded.
    xp = x if Bp == B else jnp.zeros((Bp, D), x.dtype).at[:B].set(x)

    flat_wb = []
    for (w, b) in hidden:
        flat_wb += [w, b]
    flat_wb += [w_head_t, b_head]

    def _run(single_buffer_resident):
        if single_buffer_resident and hasattr(pl, "Buffered"):
            res = lambda shape: pl.BlockSpec(shape, lambda i: (0, 0),
                                             pipeline_mode=pl.Buffered(1))
        else:
            res = lambda shape: pl.BlockSpec(shape, lambda i: (0, 0))
        in_specs = [pl.BlockSpec((TB, D), lambda i: (i, 0))]   # pipelined x tile
        for arr in flat_wb:
            in_specs.append(res(arr.shape))                    # resident weights
        return pl.pallas_call(
            _make_kernel(num_hidden),
            out_shape=jax.ShapeDtypeStruct((HEAD_ROWS, Bp), jnp.float32),
            grid_spec=pltpu.PrefetchScalarGridSpec(
                num_scalar_prefetch=0,
                grid=grid,
                in_specs=in_specs,
                out_specs=pl.BlockSpec((HEAD_ROWS, TB), lambda i: (0, i)),
            ),
            compiler_params=pltpu.CompilerParams(
                dimension_semantics=("parallel",),
                vmem_limit_bytes=vmem_limit,
            ),
        )(xp, *flat_wb)

    try:
        out = _run(True)
    except Exception:
        # Fallback if pipeline_mode=pl.Buffered(1) is unsupported on this build.
        out = _run(False)

    # Row 0 holds the logits; drop batch padding, then torch-style .squeeze():
    # (B, 1) -> (B,) for B > 1, scalar for B == 1.
    return jnp.squeeze(out[0, :B])


def init_params(key, input_dim, hidden_sizes):
    """Deterministic PyTorch-Linear-style init (uniform(-1/sqrt(fan_in), +))."""
    dims = [input_dim] + list(hidden_sizes) + [1]
    params = []
    for i in range(len(dims) - 1):
        key, kw, kb = jax.random.split(key, 3)
        fan_in, fan_out = dims[i], dims[i + 1]
        bound = 1.0 / (fan_in ** 0.5)
        w = jax.random.uniform(kw, (fan_in, fan_out), jnp.float32, -bound, bound)
        b = jax.random.uniform(kb, (1, fan_out), jnp.float32, -bound, bound)
        params.append((w, b))
    return params


def reference_forward(x, params):
    """Pure-JAX reference with matching precision (bf16 inputs, f32 accumulate)."""
    h = x.astype(jnp.bfloat16)
    n = len(params)
    for i, (w, b) in enumerate(params):
        h = jnp.dot(h, w.astype(jnp.bfloat16), preferred_element_type=jnp.float32) + b
        if i < n - 1:
            h = jnp.maximum(h, 0.0).astype(jnp.bfloat16)
    return jnp.squeeze(h)


if __name__ == "__main__":
    input_dim = 32
    hidden_sizes = [64, 32]
    batch = 8

    key = jax.random.PRNGKey(0)
    kx, kp = jax.random.split(key)
    x = jax.random.normal(kx, (batch, input_dim), jnp.float32)
    params = init_params(kp, input_dim, hidden_sizes)
    prepped = prepare_params(params)   # one-time pad/cast, hoisted off the hot path

    out = interaction_classifier_forward(x, prepped)
    out = jax.block_until_ready(out)

    ref = reference_forward(x, params)
    assert out.shape == (batch,), out.shape
    assert jnp.allclose(out, ref, atol=1e-2, rtol=1e-2), (out, ref)

    print("KERNEL_OK")
</pallas_src>

<mosaic_0001>
module attributes {stable_mosaic.version = 11 : i64} {
  func.func @kernel(%arg0: i32, %arg1: memref<16x32xf32, #tpu.memory_space<vmem>>, %arg2: memref<32x128xbf16, #tpu.memory_space<vmem>>, %arg3: memref<1x128xf32, #tpu.memory_space<vmem>>, %arg4: memref<128x128xbf16, #tpu.memory_space<vmem>>, %arg5: memref<1x128xf32, #tpu.memory_space<vmem>>, %arg6: memref<8x128xbf16, #tpu.memory_space<vmem>>, %arg7: memref<1x1xf32, #tpu.memory_space<vmem>>, %arg8: memref<8x16xf32, #tpu.memory_space<vmem>>) attributes {dimension_semantics = [#tpu.dimension_semantics<parallel>], iteration_bounds = array<i64: 1>, scalar_prefetch = 0 : i64, scratch_operands = 0 : i64, tpu.core_type = #tpu.core_type<tc>, window_params = [{transform_indices = @transform_0, window_bounds = array<i64: 16, 32>}, {pipeline_mode = #tpu.pipeline_mode<synchronous>, transform_indices = @transform_1, window_bounds = array<i64: 32, 128>}, {pipeline_mode = #tpu.pipeline_mode<synchronous>, transform_indices = @transform_2, window_bounds = array<i64: 1, 128>}, {pipeline_mode = #tpu.pipeline_mode<synchronous>, transform_indices = @transform_3, window_bounds = array<i64: 128, 128>}, {pipeline_mode = #tpu.pipeline_mode<synchronous>, transform_indices = @transform_4, window_bounds = array<i64: 1, 128>}, {pipeline_mode = #tpu.pipeline_mode<synchronous>, transform_indices = @transform_5, window_bounds = array<i64: 8, 128>}, {pipeline_mode = #tpu.pipeline_mode<synchronous>, transform_indices = @transform_6, window_bounds = array<i64: 1, 1>}, {transform_indices = @transform_7, window_bounds = array<i64: 8, 16>}]} {
    %c0 = arith.constant 0 : index
    %c0_0 = arith.constant 0 : index
    %0 = vector.load %arg1[%c0, %c0_0] : memref<16x32xf32, #tpu.memory_space<vmem>>, vector<16x32xf32>
    %1 = arith.truncf %0 : vector<16x32xf32> to vector<16x32xbf16>
    %c0_1 = arith.constant 0 : index
    %c0_2 = arith.constant 0 : index
    %2 = vector.load %arg2[%c0_1, %c0_2] : memref<32x128xbf16, #tpu.memory_space<vmem>>, vector<32x128xbf16>
    %c0_3 = arith.constant 0 : index
    %c0_4 = arith.constant 0 : index
    %3 = vector.load %arg3[%c0_3, %c0_4] : memref<1x128xf32, #tpu.memory_space<vmem>>, vector<1x128xf32>
    %cst = arith.constant dense<0.000000e+00> : vector<16x128xf32>
    %4 = tpu.matmul %1, %2, %cst {dimension_numbers = #tpu.dot_dimension_numbers<[1], [0], [0], [1], [0, 0, 1, 1], [], []>} : vector<16x32xbf16>, vector<32x128xbf16>, vector<16x128xf32> -> vector<16x128xf32>
    %5 = vector.broadcast %3 : vector<1x128xf32> to vector<16x128xf32>
    %6 = arith.addf %4, %5 : vector<16x128xf32>
    %cst_5 = arith.constant 0.000000e+00 : f32
    %7 = vector.broadcast %cst_5 : f32 to vector<16x128xf32>
    %8 = arith.maximumf %6, %7 : vector<16x128xf32>
    %9 = arith.truncf %8 : vector<16x128xf32> to vector<16x128xbf16>
    %c0_6 = arith.constant 0 : index
    %c0_7 = arith.constant 0 : index
    %10 = vector.load %arg4[%c0_6, %c0_7] : memref<128x128xbf16, #tpu.memory_space<vmem>>, vector<128x128xbf16>
    %c0_8 = arith.constant 0 : index
    %c0_9 = arith.constant 0 : index
    %11 = vector.load %arg5[%c0_8, %c0_9] : memref<1x128xf32, #tpu.memory_space<vmem>>, vector<1x128xf32>
    %cst_10 = arith.constant dense<0.000000e+00> : vector<16x128xf32>
    %12 = tpu.matmul %9, %10, %cst_10 {dimension_numbers = #tpu.dot_dimension_numbers<[1], [0], [0], [1], [0, 0, 1, 1], [], []>} : vector<16x128xbf16>, vector<128x128xbf16>, vector<16x128xf32> -> vector<16x128xf32>
    %13 = vector.broadcast %11 : vector<1x128xf32> to vector<16x128xf32>
    %14 = arith.addf %12, %13 : vector<16x128xf32>
    %cst_11 = arith.constant 0.000000e+00 : f32
    %15 = vector.broadcast %cst_11 : f32 to vector<16x128xf32>
    %16 = arith.maximumf %14, %15 : vector<16x128xf32>
    %17 = arith.truncf %16 : vector<16x128xf32> to vector<16x128xbf16>
    %c0_12 = arith.constant 0 : index
    %c0_13 = arith.constant 0 : index
    %18 = vector.load %arg6[%c0_12, %c0_13] : memref<8x128xbf16, #tpu.memory_space<vmem>>, vector<8x128xbf16>
    %c0_14 = arith.constant 0 : index
    %c0_15 = arith.constant 0 : index
    %19 = vector.load %arg7[%c0_14, %c0_15] : memref<1x1xf32, #tpu.memory_space<vmem>>, vector<1x1xf32>
    %cst_16 = arith.constant dense<0.000000e+00> : vector<8x16xf32>
    %20 = tpu.matmul %18, %17, %cst_16 {dimension_numbers = #tpu.dot_dimension_numbers<[1], [1], [0], [0], [0, 0, 1, 0], [], []>} : vector<8x128xbf16>, vector<16x128xbf16>, vector<8x16xf32> -> vector<8x16xf32>
    %21 = vector.broadcast %19 : vector<1x1xf32> to vector<8x16xf32>
    %22 = arith.addf %20, %21 : vector<8x16xf32>
    %c0_17 = arith.constant 0 : index
    %c0_18 = arith.constant 0 : index
    %23 = vector.load %arg8[%c0_17, %c0_18] : memref<8x16xf32, #tpu.memory_space<vmem>>, vector<8x16xf32>
    tpu.vector_store %arg8[%c0_17, %c0_18], %22 {strides = array<i32>} : memref<8x16xf32, #tpu.memory_space<vmem>>, vector<8x16xf32>,
    return
  }
  func.func @transform_0(%arg0: i32) -> (i32, i32) {
    %c0_i32 = arith.constant 0 : i32
    %c0_i32_0 = arith.constant 0 : i32
    return %arg0, %c0_i32 : i32, i32
  }
  func.func @transform_1(%arg0: i32) -> (i32, i32) {
    %c0_i32 = arith.constant 0 : i32
    %c0_i32_0 = arith.constant 0 : i32
    %c0_i32_1 = arith.constant 0 : i32
    return %c0_i32, %c0_i32_0 : i32, i32
  }
  func.func @transform_2(%arg0: i32) -> (i32, i32) {
    %c0_i32 = arith.constant 0 : i32
    %c0_i32_0 = arith.constant 0 : i32
    %c0_i32_1 = arith.constant 0 : i32
    return %c0_i32, %c0_i32_0 : i32, i32
  }
  func.func @transform_3(%arg0: i32) -> (i32, i32) {
    %c0_i32 = arith.constant 0 : i32
    %c0_i32_0 = arith.constant 0 : i32
    %c0_i32_1 = arith.constant 0 : i32
    return %c0_i32, %c0_i32_0 : i32, i32
  }
  func.func @transform_4(%arg0: i32) -> (i32, i32) {
    %c0_i32 = arith.constant 0 : i32
    %c0_i32_0 = arith.constant 0 : i32
    %c0_i32_1 = arith.constant 0 : i32
    return %c0_i32, %c0_i32_0 : i32, i32
  }
  func.func @transform_5(%arg0: i32) -> (i32, i32) {
    %c0_i32 = arith.constant 0 : i32
    %c0_i32_0 = arith.constant 0 : i32
    %c0_i32_1 = arith.constant 0 : i32
    return %c0_i32, %c0_i32_0 : i32, i32
  }
  func.func @transform_6(%arg0: i32) -> (i32, i32) {
    %c0_i32 = arith.constant 0 : i32
    %c0_i32_0 = arith.constant 0 : i32
    %c0_i32_1 = arith.constant 0 : i32
    return %c0_i32, %c0_i32_0 : i32, i32
  }
  func.func @transform_7(%arg0: i32) -> (i32, i32) {
    %c0_i32 = arith.constant 0 : i32
    %c0_i32_0 = arith.constant 0 : i32
    return %c0_i32, %arg0 : i32, i32
  }
}

module attributes {stable_mosaic.version = 11 : i64} {
  func.func @kernel(%arg0: i32, %arg1: memref<16x32xf32, #tpu.memory_space<vmem>>, %arg2: memref<32x128xbf16, #tpu.memory_space<vmem>>, %arg3: memref<1x128xf32, #tpu.memory_space<vmem>>, %arg4: memref<128x128xbf16, #tpu.memory_space<vmem>>, %arg5: memref<1x128xf32, #tpu.memory_space<vmem>>, %arg6: memref<8x128xbf16, #tpu.memory_space<vmem>>, %arg7: memref<1x1xf32, #tpu.memory_space<vmem>>, %arg8: memref<8x16xf32, #tpu.memory_space<vmem>>) attributes {dimension_semantics = [#tpu.dimension_semantics<parallel>], iteration_bounds = array<i64: 1>, scalar_prefetch = 0 : i64, scratch_operands = 0 : i64, tpu.core_type = #tpu.core_type<tc>, window_params = [{transform_indices = @transform_0, window_bounds = array<i64: 16, 32>}, {pipeline_mode = #tpu.pipeline_mode<synchronous>, transform_indices = @transform_1, window_bounds = array<i64: 32, 128>}, {pipeline_mode = #tpu.pipeline_mode<synchronous>, transform_indices = @transform_2, window_bounds = array<i64: 1, 128>}, {pipeline_mode = #tpu.pipeline_mode<synchronous>, transform_indices = @transform_3, window_bounds = array<i64: 128, 128>}, {pipeline_mode = #tpu.pipeline_mode<synchronous>, transform_indices = @transform_4, window_bounds = array<i64: 1, 128>}, {pipeline_mode = #tpu.pipeline_mode<synchronous>, transform_indices = @transform_5, window_bounds = array<i64: 8, 128>}, {pipeline_mode = #tpu.pipeline_mode<synchronous>, transform_indices = @transform_6, window_bounds = array<i64: 1, 1>}, {transform_indices = @transform_7, window_bounds = array<i64: 8, 16>}]} {
    %c0 = arith.constant 0 : index
    %c0_0 = arith.constant 0 : index
    %0 = vector.load %arg1[%c0, %c0_0] : memref<16x32xf32, #tpu.memory_space<vmem>>, vector<16x32xf32>
    %1 = arith.truncf %0 : vector<16x32xf32> to vector<16x32xbf16>
    %c0_1 = arith.constant 0 : index
    %c0_2 = arith.constant 0 : index
    %2 = vector.load %arg2[%c0_1, %c0_2] : memref<32x128xbf16, #tpu.memory_space<vmem>>, vector<32x128xbf16>
    %c0_3 = arith.constant 0 : index
    %c0_4 = arith.constant 0 : index
    %3 = vector.load %arg3[%c0_3, %c0_4] : memref<1x128xf32, #tpu.memory_space<vmem>>, vector<1x128xf32>
    %cst = arith.constant dense<0.000000e+00> : vector<16x128xf32>
    %4 = tpu.matmul %1, %2, %cst {dimension_numbers = #tpu.dot_dimension_numbers<[1], [0], [0], [1], [0, 0, 1, 1], [], []>} : vector<16x32xbf16>, vector<32x128xbf16>, vector<16x128xf32> -> vector<16x128xf32>
    %5 = vector.broadcast %3 : vector<1x128xf32> to vector<16x128xf32>
    %6 = arith.addf %4, %5 : vector<16x128xf32>
    %cst_5 = arith.constant 0.000000e+00 : f32
    %7 = vector.broadcast %cst_5 : f32 to vector<16x128xf32>
    %8 = arith.maximumf %6, %7 : vector<16x128xf32>
    %9 = arith.truncf %8 : vector<16x128xf32> to vector<16x128xbf16>
    %c0_6 = arith.constant 0 : index
    %c0_7 = arith.constant 0 : index
    %10 = vector.load %arg4[%c0_6, %c0_7] : memref<128x128xbf16, #tpu.memory_space<vmem>>, vector<128x128xbf16>
    %c0_8 = arith.constant 0 : index
    %c0_9 = arith.constant 0 : index
    %11 = vector.load %arg5[%c0_8, %c0_9] : memref<1x128xf32, #tpu.memory_space<vmem>>, vector<1x128xf32>
    %cst_10 = arith.constant dense<0.000000e+00> : vector<16x128xf32>
    %12 = tpu.matmul %9, %10, %cst_10 {dimension_numbers = #tpu.dot_dimension_numbers<[1], [0], [0], [1], [0, 0, 1, 1], [], []>} : vector<16x128xbf16>, vector<128x128xbf16>, vector<16x128xf32> -> vector<16x128xf32>
    %13 = vector.broadcast %11 : vector<1x128xf32> to vector<16x128xf32>
    %14 = arith.addf %12, %13 : vector<16x128xf32>
    %cst_11 = arith.constant 0.000000e+00 : f32
    %15 = vector.broadcast %cst_11 : f32 to vector<16x128xf32>
    %16 = arith.maximumf %14, %15 : vector<16x128xf32>
    %17 = arith.truncf %16 : vector<16x128xf32> to vector<16x128xbf16>
    %c0_12 = arith.constant 0 : index
    %c0_13 = arith.constant 0 : index
    %18 = vector.load %arg6[%c0_12, %c0_13] : memref<8x128xbf16, #tpu.memory_space<vmem>>, vector<8x128xbf16>
    %c0_14 = arith.constant 0 : index
    %c0_15 = arith.constant 0 : index
    %19 = vector.load %arg7[%c0_14, %c0_15] : memref<1x1xf32, #tpu.memory_space<vmem>>, vector<1x1xf32>
    %cst_16 = arith.constant dense<0.000000e+00> : vector<8x16xf32>
    %20 = tpu.matmul %18, %17, %cst_16 {dimension_numbers = #tpu.dot_dimension_numbers<[1], [1], [0], [0], [0, 0, 1, 0], [], []>} : vector<8x128xbf16>, vector<16x128xbf16>, vector<8x16xf32> -> vector<8x16xf32>
    %21 = vector.broadcast %19 : vector<1x1xf32> to vector<8x16xf32>
    %22 = arith.addf %20, %21 : vector<8x16xf32>
    %c0_17 = arith.constant 0 : index
    %c0_18 = arith.constant 0 : index
    %23 = vector.load %arg8[%c0_17, %c0_18] : memref<8x16xf32, #tpu.memory_space<vmem>>, vector<8x16xf32>
    tpu.vector_store %arg8[%c0_17, %c0_18], %22 {strides = array<i32>} : memref<8x16xf32, #tpu.memory_space<vmem>>, vector<8x16xf32>,
    return
  }
  func.func @transform_0(%arg0: i32) -> (i32, i32) {
    %c0_i32 = arith.constant 0 : i32
    %c0_i32_0 = arith.constant 0 : i32
    return %arg0, %c0_i32 : i32, i32
  }
  func.func @transform_1(%arg0: i32) -> (i32, i32) {
    %c0_i32 = arith.constant 0 : i32
    %c0_i32_0 = arith.constant 0 : i32
    %c0_i32_1 = arith.constant 0 : i32
    return %c0_i32, %c0_i32_0 : i32, i32
  }
  func.func @transform_2(%arg0: i32) -> (i32, i32) {
    %c0_i32 = arith.constant 0 : i32
    %c0_i32_0 = arith.constant 0 : i32
    %c0_i32_1 = arith.constant 0 : i32
    return %c0_i32, %c0_i32_0 : i32, i32
  }
  func.func @transform_3(%arg0: i32) -> (i32, i32) {
    %c0_i32 = arith.constant 0 : i32
    %c0_i32_0 = arith.constant 0 : i32
    %c0_i32_1 = arith.constant 0 : i32
    return %c0_i32, %c0_i32_0 : i32, i32
  }
  func.func @transform_4(%arg0: i32) -> (i32, i32) {
    %c0_i32 = arith.constant 0 : i32
    %c0_i32_0 = arith.constant 0 : i32
    %c0_i32_1 = arith.constant 0 : i32
    return %c0_i32, %c0_i32_0 : i32, i32
  }
  func.func @transform_5(%arg0: i32) -> (i32, i32) {
    %c0_i32 = arith.constant 0 : i32
    %c0_i32_0 = arith.constant 0 : i32
    %c0_i32_1 = arith.constant 0 : i32
    return %c0_i32, %c0_i32_0 : i32, i32
  }
  func.func @transform_6(%arg0: i32) -> (i32, i32) {
    %c0_i32 = arith.constant 0 : i32
    %c0_i32_0 = arith.constant 0 : i32
    %c0_i32_1 = arith.constant 0 : i32
    return %c0_i32, %c0_i32_0 : i32, i32
  }
  func.func @transform_7(%arg0: i32) -> (i32, i32) {
    %c0_i32 = arith.constant 0 : i32
    %c0_i32_0 = arith.constant 0 : i32
    return %c0_i32, %arg0 : i32, i32
  }
}

</mosaic_0001>

<bundles_post_ra>
// kernel: tpu_custom_call.1
= control target key start
LH: loop header
LB: loop body
LE: loop exit
PB: predicated region body
PF: predicated region fallthrough
CT: control target
= control target key end

     0   :  { %s577_s0 = inlined_call_operand.hbm [shape: f32[16,32], index: 0, kind: input, shape index: {}]   ;;  %s578_s1 = inlined_call_operand.hbm [shape: bf16[32,128], index: 1, kind: input, shape index: {}]   ;;  %s579_s2 = inlined_call_operand.vmem [shape: f32[1,128], index: 2, kind: input, shape index: {}]   ;;  %s580_s3 = inlined_call_operand.hbm [shape: bf16[128,128], index: 3, kind: input, shape index: {}]   ;;  %s581_s4 = inlined_call_operand.vmem [shape: f32[1,128], index: 4, kind: input, shape index: {}]   ;;  %s582_s5 = inlined_call_operand.vmem [shape: bf16[8,128], index: 5, kind: input, shape index: {}]   ;;  %s583_s6 = inlined_call_operand.<no memory space> [shape: f32[1,1], index: 6, kind: input, shape index: {}]   ;;  %s584_s7 = inlined_call_operand.hbm [shape: f32[8,16], index: 7, kind: output, shape index: {}]  }
   0x1   :  { %v12_v0 = vstv %s583_s6 }
   0x2   :  { %13 = vst [vmem:[#allocation2] sm:$0x1] %v12_v0 }
   0x3   :  { %14 = vsyncpa [#allocation4], 0 }
   0x4   :  { %15 = vsyncpa [#allocation7], 0 }
   0x5   :  { %16 = vsyncpa [#allocation5], 0  ;;  %s499_s26 = smov [#allocation6]  }
   0x6   :  { %s34_s27 = sshll.u32 %s499_s26, 4  ;;  %s35_s27 = int_to_ptr.vmem [resolvable:$true] %s34_s27 }
   0x7   :  { %s421_s28 = scalar_lea.vmem %s35_s27, 256  ;;  %p426_p1 = scmp.lt.s32.totalorder %s35_s27, %s35_s27 }
   0x8   :  { %p422_p0 = scmp.ne.s32.totalorder %s35_s27, %s421_s28  ;;  %p427_p2 = scmp.lt.s32.totalorder %s421_s28, %s421_s28 }
   0xa   :  { %p428_p3 = por %p427_p2, %p426_p1 }
   0xc   :  { %p429_p4 = pnand %p428_p3, %p422_p0 }
   0xe   :  { %432 = shalt.err (!%p429_p4)
}
   0xf   :  { %s500_s29 = smov 64   ;;  %s501_s30 = smov 4  }
  0x10   :  { %40 = dma.hbm_to_vmem [thread:$0]  %s578_s1, 256, %s35_s27, [#allocation7], %s500_s29, %s500_s29, %s501_s30  }
  0x11   :  { %s502_s6 = smov [#allocation3]  }
  0x12   :  { %s22_s10 = sshll.u32 %s502_s6, 4  ;;  %s23_s10 = int_to_ptr.vmem [resolvable:$true] %s22_s10 }
  0x13   :  { %s441_s11 = scalar_lea.vmem %s23_s10, 256  ;;  %p446_p6 = scmp.lt.s32.totalorder %s23_s10, %s23_s10 }
  0x14   :  { %p442_p5 = scmp.ne.s32.totalorder %s23_s10, %s441_s11  ;;  %p447_p7 = scmp.lt.s32.totalorder %s441_s11, %s441_s11 }
  0x16   :  { %p448_p8 = por %p447_p7, %p446_p6 }
  0x18   :  { %p449_p9 = pnand %p448_p8, %p442_p5 }
  0x1a   :  { %452 = shalt.err (!%p449_p9)
}
  0x1b   :  { %s503_s12 = smov 128   ;;  %s504_s13 = smov 8  }
  0x1c   :  { %28 = dma.hbm_to_vmem [thread:$0]  %s577_s0, 256, %s23_s10, [#allocation4], %s503_s12, %s503_s12, %s504_s13  }
  0x1d   :  { %s505_s16 = smov [#allocation8]  }
  0x1e   :  { %s48_s17 = sshll.u32 %s505_s16, 4  ;;  %s49_s17 = int_to_ptr.vmem [resolvable:$true] %s48_s17 }
  0x1f   :  { %s461_s1 = scalar_lea.vmem %s49_s17, 1024  ;;  %p466_p11 = scmp.lt.s32.totalorder %s49_s17, %s49_s17 }
  0x20   :  { %p462_p10 = scmp.ne.s32.totalorder %s49_s17, %s461_s1  ;;  %p467_p12 = scmp.lt.s32.totalorder %s461_s1, %s461_s1 }
  0x22   :  { %p468_p13 = por %p467_p12, %p466_p11 }
  0x24   :  { %p469_p0 = pnand %p468_p13, %p462_p10 }
  0x26   :  { %472 = shalt.err (!%p469_p0)
}
  0x27   :  { %54 = dma.hbm_to_vmem [thread:$0]  %s580_s3, 1024, %s49_s17, [#allocation7], %s500_s29, %s500_s29, %s501_s30  }
  0x28   :  { %493 = dma.done.wait [#allocation4], 256  }
  0x29   :  { %494 = vsyncadd [#allocation4], 4294967040 }
  0x2a   :  { %495 = dma.done.wait [#allocation7], 1280  }
  0x2b   :  { %496 = vsyncadd [#allocation7], 4294966016  ;;  %v506_v1 = vmov 0.0   ;;  %vm507_vm0 = vmmov 0   ;;  %v403_v2 = vld [vmem:[#allocation6 + $0x8] sm:$0xff]   ;;  %v404_v3 = vld [vmem:[#allocation6] sm:$0xff]  }
  0x2c   :  { %357 = vmatprep.subr.bf16.mxu0 %v506_v1  ;;  %361 = vmatprep.mubr.msk.bf16.mxu0 %vm507_vm0, %v506_v1  ;;  %v71_v4 = vld [vmem:[#allocation3] sm:$0xff]  ;;  %v72_v5 = vld [vmem:[#allocation3 + $0x8] sm:$0xff]  ;;  %v405_v6 = vld [vmem:[#allocation8 + $0x38] sm:$0xff]   ;;  %vm97_vm1 = vcmask 261120   ;;  %v508_v26 = vmov 0   ;;  %s509_s23 = smov [#allocation9]  }
  0x2d   :  { %365 = vmatprep.subr.bf16.mxu1 %v506_v1  ;;  %381 = vmatprep.mubr.msk.bf16.mxu1 %vm507_vm0, %v506_v1  ;;  %v73_v7 = vpack.c.bf16 %v72_v5, %v71_v4  ;;  %v406_v8 = vld [vmem:[#allocation8 + $0x30] sm:$0xff]   ;;  %v407_v9 = vld [vmem:[#allocation8 + $0x28] sm:$0xff]   ;;  %v408_v10 = vld [vmem:[#allocation8 + $0x20] sm:$0xff]   ;;  %s319_s24 = sshll.u32 %s509_s23, 4  ;;  %vm311_vm2 = vcmask 130048   ;;  %s320_s24 = int_to_ptr.vmem [resolvable:$true] %s319_s24 }
  0x2e   :  { %358 = vmatpush3.bf16.msra.mxu0 %v403_v2  ;;  %366 = vmatpush3.bf16.msra.mxu1 %v405_v6  ;;  %v409_v11 = vld [vmem:[#allocation8 + $0x18] sm:$0xff]   ;;  %v410_v12 = vld [vmem:[#allocation8 + $0x10] sm:$0xff]   ;;  %v411_v13 = vld [vmem:[#allocation8 + $0x8] sm:$0xff]   ;;  %p478_p2 = scmp.lt.s32.totalorder %s320_s24, %s320_s24 }
  0x2f   :  { %359 = vmatprep.subr.bf16.mxu0 %v506_v1  ;;  %367 = vmatprep.subr.bf16.mxu1 %v506_v1  ;;  %v412_v14 = vld [vmem:[#allocation8] sm:$0xff]   ;;  %v329_v15 = vld [vmem:[%s579_s2] ss:$0 sm:$0xff] }
  0x30   :  { %v342_v25 = vld [vmem:[#allocation2] ss:$0 sm:$0xff]  ;;  %402 = vset.pattern.permute.xlu0 %v508_v26 }
  0x31   :  { %268 = vperm.xlu0 %402, %v342_v25   ;;  %v333_v27 = vld [vmem:[%s581_s4] ss:$0 sm:$0xff]  ;;  %s473_s4 = scalar_lea.vmem %s320_s24, 128 }
  0x32   :  { %360 = vmatpush3.bf16.msra.mxu0 %v404_v3  ;;  %368 = vmatpush3.bf16.msra.mxu1 %v406_v8  ;;  %v260_v37 = vld [vmem:[%s582_s5] sm:$0xf]  ;;  %p474_p1 = scmp.ne.s32.totalorder %s320_s24, %s473_s4  ;;  %p479_p3 = scmp.lt.s32.totalorder %s473_s4, %s473_s4 }
  0x33   :  { %385 = vmatprep.subr.bf16.mxu0 %v506_v1  ;;  %369 = vmatprep.subr.bf16.mxu1 %v506_v1 }
  0x34   :  { %p480_p4 = por %p479_p3, %p478_p2 }
  0x35   :  { %362 = vmatmul.mubr.msk.bf16.vlgmr.msra.gmra.mxu0 %vm97_vm1, %v73_v7 }
  0x36   :  { %387 = vmatprep.mubr.msk.bf16.mxu0 %vm507_vm0, %v506_v1  ;;  %370 = vmatpush3.bf16.msra.mxu1 %v407_v9  ;;  %p481_p5 = pnand %p480_p4, %p474_p1 }
  0x37   :  { %371 = vmatprep.subr.bf16.mxu1 %v506_v1 }
  0x3a   :  { %372 = vmatpush3.bf16.msra.mxu1 %v408_v10 }
  0x3b   :  { %373 = vmatprep.subr.bf16.mxu1 %v506_v1 }
  0x3e   :  { %374 = vmatpush3.bf16.msra.mxu1 %v409_v11 }
  0x3f   :  { %375 = vmatprep.subr.bf16.mxu1 %v506_v1 }
  0x42   :  { %376 = vmatpush3.bf16.msra.mxu1 %v410_v12 }
  0x43   :  { %377 = vmatprep.subr.bf16.mxu1 %v506_v1 }
  0x46   :  { %378 = vmatpush3.bf16.msra.mxu1 %v411_v13 }
  0x47   :  { %379 = vmatprep.subr.bf16.mxu1 %v506_v1 }
  0x4a   :  { %380 = vmatpush3.bf16.msra.mxu1 %v412_v14 }
  0xac   :  { %v269_v38 = vpop.permute.xlu0 %268 }
  0xf5   :  { %v135_v16 = vpop.f32.mrf.mxu0 }
  0xf6   :  { %v136_v18 = vadd.f32 %v329_v15, %v135_v16 }
  0xf7   :  { %v363_v17 = vpop.f32.mrf.mxu0 }
  0xf8   :  { %v142_v22 = vmax.f32 %v136_v18, 0.0 }
  0xf9   :  { %v138_v19 = vpop.f32.mrf.mxu0 }
  0xfa   :  { %v139_v20 = vadd.f32 %v329_v15, %v138_v19 }
  0xfb   :  { %v364_v21 = vpop.f32.mrf.mxu0 }
  0xfc   :  { %v143_v23 = vmax.f32 %v139_v20, 0.0 }
  0xfe   :  { %v144_v24 = vpack.c.bf16 %v143_v23, %v142_v22 }
 0x100   :  { %382 = vmatmul.mubr.bf16.vlgmr.msra.gmra.mxu1 %v144_v24 }
 0x1c0   :  { %v250_v28 = vpop.f32.mrf.mxu1 }
 0x1c1   :  { %v251_v30 = vadd.f32 %v333_v27, %v250_v28 }
 0x1c2   :  { %v383_v29 = vpop.f32.mrf.mxu1 }
 0x1c3   :  { %v257_v34 = vmax.f32 %v251_v30, 0.0 }
 0x1c4   :  { %v253_v31 = vpop.f32.mrf.mxu1 }
 0x1c5   :  { %v254_v32 = vadd.f32 %v333_v27, %v253_v31 }
 0x1c6   :  { %v384_v33 = vpop.f32.mrf.mxu1 }
 0x1c7   :  { %v258_v35 = vmax.f32 %v254_v32, 0.0 }
 0x1c9   :  { %v259_v36 = vpack.c.bf16 %v258_v35, %v257_v34 }
 0x1cb   :  { %386 = vmatpush3.bf16.xpose.msra.mxu0 %v259_v36 }
 0x1d2   :  { %388 = vmatmul.mubr.bf16.vlgmr.msra.gmra.mxu0 %v260_v37 }
 0x292   :  { %v305_v39 = vpop.f32.mrf.mxu0 }
 0x293   :  { %v306_v40 = vadd.f32 %v305_v39, %v269_v38 }
 0x294   :  { %v389_v41 = vpop.f32.mrf.mxu0 }
 0x295   :  { %312 = vst.msk [vmem:[#allocation9] sm:$0xff] %vm311_vm2, %v306_v40 }
 0x296   :  { %v308_v42 = vpop.f32.mrf.mxu0 }
 0x297   :  { %484 = shalt.err (!%p481_p5)
}
 0x298   :  { %322 = dma.vmem_to_hbm [thread:$0]  %s320_s24, 128, %s584_s7, [#allocation5]   ;;  %v390_v43 = vpop.f32.mrf.mxu0 }
 0x299   :  { %497 = dma.done.wait [#allocation5], 128  }
 0x29a   :  { %498 = vsyncadd [#allocation5], 4294967168 }
 0x29b   :  { %326 = vsyncpa [#allocation4], 1 }
 0x29c   :  { %327 = vsyncpa [#allocation7], 1 }
 0x29d   :  { %328 = vsyncpa [#allocation5], 1 }

// kernel: tpu_custom_call.1
= control target key start
LH: loop header
LB: loop body
LE: loop exit
PB: predicated region body
PF: predicated region fallthrough
CT: control target
= control target key end

     0   :  { %s577_s0 = inlined_call_operand.hbm [shape: f32[16,32], index: 0, kind: input, shape index: {}]   ;;  %s578_s1 = inlined_call_operand.hbm [shape: bf16[32,128], index: 1, kind: input, shape index: {}]   ;;  %s579_s2 = inlined_call_operand.vmem [shape: f32[1,128], index: 2, kind: input, shape index: {}]   ;;  %s580_s3 = inlined_call_operand.hbm [shape: bf16[128,128], index: 3, kind: input, shape index: {}]   ;;  %s581_s4 = inlined_call_operand.vmem [shape: f32[1,128], index: 4, kind: input, shape index: {}]   ;;  %s582_s5 = inlined_call_operand.vmem [shape: bf16[8,128], index: 5, kind: input, shape index: {}]   ;;  %s583_s6 = inlined_call_operand.<no memory space> [shape: f32[1,1], index: 6, kind: input, shape index: {}]   ;;  %s584_s7 = inlined_call_operand.hbm [shape: f32[8,16], index: 7, kind: output, shape index: {}]  }
   0x1   :  { %v12_v0 = vstv %s583_s6 }
   0x2   :  { %13 = vst [vmem:[#allocation2] sm:$0x1] %v12_v0 }
   0x3   :  { %14 = vsyncpa [#allocation4], 0 }
   0x4   :  { %15 = vsyncpa [#allocation7], 0 }
   0x5   :  { %16 = vsyncpa [#allocation5], 0  ;;  %s499_s26 = smov [#allocation6]  }
   0x6   :  { %s34_s27 = sshll.u32 %s499_s26, 4  ;;  %s35_s27 = int_to_ptr.vmem [resolvable:$true] %s34_s27 }
   0x7   :  { %s421_s28 = scalar_lea.vmem %s35_s27, 256  ;;  %p426_p1 = scmp.lt.s32.totalorder %s35_s27, %s35_s27 }
   0x8   :  { %p422_p0 = scmp.ne.s32.totalorder %s35_s27, %s421_s28  ;;  %p427_p2 = scmp.lt.s32.totalorder %s421_s28, %s421_s28 }
   0xa   :  { %p428_p3 = por %p427_p2, %p426_p1 }
   0xc   :  { %p429_p4 = pnand %p428_p3, %p422_p0 }
   0xe   :  { %432 = shalt.err (!%p429_p4)
}
   0xf   :  { %s500_s29 = smov 64   ;;  %s501_s30 = smov 4  }
  0x10   :  { %40 = dma.hbm_to_vmem [thread:$0]  %s578_s1, 256, %s35_s27, [#allocation7], %s500_s29, %s500_s29, %s501_s30  }
  0x11   :  { %s502_s6 = smov [#allocation3]  }
  0x12   :  { %s22_s10 = sshll.u32 %s502_s6, 4  ;;  %s23_s10 = int_to_ptr.vmem [resolvable:$true] %s22_s10 }
  0x13   :  { %s441_s11 = scalar_lea.vmem %s23_s10, 256  ;;  %p446_p6 = scmp.lt.s32.totalorder %s23_s10, %s23_s10 }
  0x14   :  { %p442_p5 = scmp.ne.s32.totalorder %s23_s10, %s441_s11  ;;  %p447_p7 = scmp.lt.s32.totalorder %s441_s11, %s441_s11 }
  0x16   :  { %p448_p8 = por %p447_p7, %p446_p6 }
  0x18   :  { %p449_p9 = pnand %p448_p8, %p442_p5 }
  0x1a   :  { %452 = shalt.err (!%p449_p9)
}
  0x1b   :  { %s503_s12 = smov 128   ;;  %s504_s13 = smov 8  }
  0x1c   :  { %28 = dma.hbm_to_vmem [thread:$0]  %s577_s0, 256, %s23_s10, [#allocation4], %s503_s12, %s503_s12, %s504_s13  }
  0x1d   :  { %s505_s16 = smov [#allocation8]  }
  0x1e   :  { %s48_s17 = sshll.u32 %s505_s16, 4  ;;  %s49_s17 = int_to_ptr.vmem [resolvable:$true] %s48_s17 }
  0x1f   :  { %s461_s1 = scalar_lea.vmem %s49_s17, 1024  ;;  %p466_p11 = scmp.lt.s32.totalorder %s49_s17, %s49_s17 }
  0x20   :  { %p462_p10 = scmp.ne.s32.totalorder %s49_s17, %s461_s1  ;;  %p467_p12 = scmp.lt.s32.totalorder %s461_s1, %s461_s1 }
  0x22   :  { %p468_p13 = por %p467_p12, %p466_p11 }
  0x24   :  { %p469_p0 = pnand %p468_p13, %p462_p10 }
  0x26   :  { %472 = shalt.err (!%p469_p0)
}
  0x27   :  { %54 = dma.hbm_to_vmem [thread:$0]  %s580_s3, 1024, %s49_s17, [#allocation7], %s500_s29, %s500_s29, %s501_s30  }
  0x28   :  { %493 = dma.done.wait [#allocation4], 256  }
  0x29   :  { %494 = vsyncadd [#allocation4], 4294967040 }
  0x2a   :  { %495 = dma.done.wait [#allocation7], 1280  }
  0x2b   :  { %496 = vsyncadd [#allocation7], 4294966016  ;;  %v506_v1 = vmov 0.0   ;;  %vm507_vm0 = vmmov 0   ;;  %v403_v2 = vld [vmem:[#allocation6 + $0x8] sm:$0xff]   ;;  %v404_v3 = vld [vmem:[#allocation6] sm:$0xff]  }
  0x2c   :  { %357 = vmatprep.subr.bf16.mxu0 %v506_v1  ;;  %361 = vmatprep.mubr.msk.bf16.mxu0 %vm507_vm0, %v506_v1  ;;  %v71_v4 = vld [vmem:[#allocation3] sm:$0xff]  ;;  %v72_v5 = vld [vmem:[#allocation3 + $0x8] sm:$0xff]  ;;  %v405_v6 = vld [vmem:[#allocation8 + $0x38] sm:$0xff]   ;;  %vm97_vm1 = vcmask 261120   ;;  %v508_v26 = vmov 0   ;;  %s509_s23 = smov [#allocation9]  }
  0x2d   :  { %365 = vmatprep.subr.bf16.mxu1 %v506_v1  ;;  %381 = vmatprep.mubr.msk.bf16.mxu1 %vm507_vm0, %v506_v1  ;;  %v73_v7 = vpack.c.bf16 %v72_v5, %v71_v4  ;;  %v406_v8 = vld [vmem:[#allocation8 + $0x30] sm:$0xff]   ;;  %v407_v9 = vld [vmem:[#allocation8 + $0x28] sm:$0xff]   ;;  %v408_v10 = vld [vmem:[#allocation8 + $0x20] sm:$0xff]   ;;  %s319_s24 = sshll.u32 %s509_s23, 4  ;;  %vm311_vm2 = vcmask 130048   ;;  %s320_s24 = int_to_ptr.vmem [resolvable:$true] %s319_s24 }
  0x2e   :  { %358 = vmatpush3.bf16.msra.mxu0 %v403_v2  ;;  %366 = vmatpush3.bf16.msra.mxu1 %v405_v6  ;;  %v409_v11 = vld [vmem:[#allocation8 + $0x18] sm:$0xff]   ;;  %v410_v12 = vld [vmem:[#allocation8 + $0x10] sm:$0xff]   ;;  %v411_v13 = vld [vmem:[#allocation8 + $0x8] sm:$0xff]   ;;  %p478_p2 = scmp.lt.s32.totalorder %s320_s24, %s320_s24 }
  0x2f   :  { %359 = vmatprep.subr.bf16.mxu0 %v506_v1  ;;  %367 = vmatprep.subr.bf16.mxu1 %v506_v1  ;;  %v412_v14 = vld [vmem:[#allocation8] sm:$0xff]   ;;  %v329_v15 = vld [vmem:[%s579_s2] ss:$0 sm:$0xff] }
  0x30   :  { %v342_v25 = vld [vmem:[#allocation2] ss:$0 sm:$0xff]  ;;  %402 = vset.pattern.permute.xlu0 %v508_v26 }
  0x31   :  { %268 = vperm.xlu0 %402, %v342_v25   ;;  %v333_v27 = vld [vmem:[%s581_s4] ss:$0 sm:$0xff]  ;;  %s473_s4 = scalar_lea.vmem %s320_s24, 128 }
  0x32   :  { %360 = vmatpush3.bf16.msra.mxu0 %v404_v3  ;;  %368 = vmatpush3.bf16.msra.mxu1 %v406_v8  ;;  %v260_v37 = vld [vmem:[%s582_s5] sm:$0xf]  ;;  %p474_p1 = scmp.ne.s32.totalorder %s320_s24, %s473_s4  ;;  %p479_p3 = scmp.lt.s32.totalorder %s473_s4, %s473_s4 }
  0x33   :  { %385 = vmatprep.subr.bf16.mxu0 %v506_v1  ;;  %369 = vmatprep.subr.bf16.mxu1 %v506_v1 }
  0x34   :  { %p480_p4 = por %p479_p3, %p478_p2 }
  0x35   :  { %362 = vmatmul.mubr.msk.bf16.vlgmr.msra.gmra.mxu0 %vm97_vm1, %v73_v7 }
  0x36   :  { %387 = vmatprep.mubr.msk.bf16.mxu0 %vm507_vm0, %v506_v1  ;;  %370 = vmatpush3.bf16.msra.mxu1 %v407_v9  ;;  %p481_p5 = pnand %p480_p4, %p474_p1 }
  0x37   :  { %371 = vmatprep.subr.bf16.mxu1 %v506_v1 }
  0x3a   :  { %372 = vmatpush3.bf16.msra.mxu1 %v408_v10 }
  0x3b   :  { %373 = vmatprep.subr.bf16.mxu1 %v506_v1 }
  0x3e   :  { %374 = vmatpush3.bf16.msra.mxu1 %v409_v11 }
  0x3f   :  { %375 = vmatprep.subr.bf16.mxu1 %v506_v1 }
  0x42   :  { %376 = vmatpush3.bf16.msra.mxu1 %v410_v12 }
  0x43   :  { %377 = vmatprep.subr.bf16.mxu1 %v506_v1 }
  0x46   :  { %378 = vmatpush3.bf16.msra.mxu1 %v411_v13 }
  0x47   :  { %379 = vmatprep.subr.bf16.mxu1 %v506_v1 }
  0x4a   :  { %380 = vmatpush3.bf16.msra.mxu1 %v412_v14 }
  0xac   :  { %v269_v38 = vpop.permute.xlu0 %268 }
  0xf5   :  { %v135_v16 = vpop.f32.mrf.mxu0 }
  0xf6   :  { %v136_v18 = vadd.f32 %v329_v15, %v135_v16 }
  0xf7   :  { %v363_v17 = vpop.f32.mrf.mxu0 }
  0xf8   :  { %v142_v22 = vmax.f32 %v136_v18, 0.0 }
  0xf9   :  { %v138_v19 = vpop.f32.mrf.mxu0 }
  0xfa   :  { %v139_v20 = vadd.f32 %v329_v15, %v138_v19 }
  0xfb   :  { %v364_v21 = vpop.f32.mrf.mxu0 }
  0xfc   :  { %v143_v23 = vmax.f32 %v139_v20, 0.0 }
  0xfe   :  { %v144_v24 = vpack.c.bf16 %v143_v23, %v142_v22 }
 0x100   :  { %382 = vmatmul.mubr.bf16.vlgmr.msra.gmra.mxu1 %v144_v24 }
 0x1c0   :  { %v250_v28 = vpop.f32.mrf.mxu1 }
 0x1c1   :  { %v251_v30 = vadd.f32 %v333_v27, %v250_v28 }
 0x1c2   :  { %v383_v29 = vpop.f32.mrf.mxu1 }
 0x1c3   :  { %v257_v34 = vmax.f32 %v251_v30, 0.0 }
 0x1c4   :  { %v253_v31 = vpop.f32.mrf.mxu1 }
 0x1c5   :  { %v254_v32 = vadd.f32 %v333_v27, %v253_v31 }
 0x1c6   :  { %v384_v33 = vpop.f32.mrf.mxu1 }
 0x1c7   :  { %v258_v35 = vmax.f32 %v254_v32, 0.0 }
 0x1c9   :  { %v259_v36 = vpack.c.bf16 %v258_v35, %v257_v34 }
 0x1cb   :  { %386 = vmatpush3.bf16.xpose.msra.mxu0 %v259_v36 }
 0x1d2   :  { %388 = vmatmul.mubr.bf16.vlgmr.msra.gmra.mxu0 %v260_v37 }
 0x292   :  { %v305_v39 = vpop.f32.mrf.mxu0 }
 0x293   :  { %v306_v40 = vadd.f32 %v305_v39, %v269_v38 }
 0x294   :  { %v389_v41 = vpop.f32.mrf.mxu0 }
 0x295   :  { %312 = vst.msk [vmem:[#allocation9] sm:$0xff] %vm311_vm2, %v306_v40 }
 0x296   :  { %v308_v42 = vpop.f32.mrf.mxu0 }
 0x297   :  { %484 = shalt.err (!%p481_p5)
}
 0x298   :  { %322 = dma.vmem_to_hbm [thread:$0]  %s320_s24, 128, %s584_s7, [#allocation5]   ;;  %v390_v43 = vpop.f32.mrf.mxu0 }
 0x299   :  { %497 = dma.done.wait [#allocation5], 128  }
 0x29a   :  { %498 = vsyncadd [#allocation5], 4294967168 }
 0x29b   :  { %326 = vsyncpa [#allocation4], 1 }
 0x29c   :  { %327 = vsyncpa [#allocation7], 1 }
 0x29d   :  { %328 = vsyncpa [#allocation5], 1 }

</bundles_post_ra>
